<compile_context>
chip_gen: v7x
topology: tpu7x:2x2x1
jax: 0.10.0
libtpu: 0.0.40
codegen_flags: <defaults>
</compile_context>

<pallas_src>
import functools

import numpy as np
import jax
import jax.numpy as jnp
from jax import lax
from jax.experimental import pallas as pl
from jax.experimental.pallas import tpu as pltpu

ADD_DICE = 1.0      # args.hierarchyloss_with_dice (True)
_NEG_FILL = -1e9    # pad logit -> sigmoid == 0 exactly, so pads contribute nothing


def _round_up(x, m):
    return (x + m - 1) // m * m


def _cdiv(a, b):
    return (a + b - 1) // b


def _plan(N, C):
    """Static tiling plan: (c_pad, lane_chunk, tile_n, n_pad, num_tiles, r_lanes)."""
    c_pad = _round_up(C, 8)                       # classes -> sublanes
    n128 = _round_up(max(int(N), 1), 128)         # batch rows -> lanes
    # Lane chunk: keep the class-loop working set (~5 live (c_pad, lane_chunk) arrays
    # + carried partial sums) comfortably inside the 64-vreg file.
    lane_chunk = 128
    while lane_chunk < 512 and c_pad * (lane_chunk * 2) <= 4096:
        lane_chunk *= 2
    lane_chunk = min(lane_chunk, n128)
    # DMA tile: large enough to amortize the ~0.35us/grid-step overhead, but
    # (a) <= ~half the padded batch so both v7x TensorCores get work,
    # (b) VMEM-bounded so the same tiling fits v5e/v6e/v7x scoped-VMEM budgets.
    tile_target = 4096 if c_pad <= 64 else 1024
    half = _round_up(_cdiv(n128, 2), lane_chunk)
    tile_n = max(lane_chunk, min(_round_up(tile_target, lane_chunk), half))
    while tile_n > lane_chunk and 6 * c_pad * tile_n * 4 > 16 * 1024 * 1024:
        tile_n -= lane_chunk
    n_pad = _round_up(n128, tile_n)
    num_tiles = n_pad // tile_n
    # Replicate R columns across the lane chunk only while it stays tiny.
    r_lanes = lane_chunk if c_pad <= 64 else 1
    return c_pad, lane_chunk, tile_n, n_pad, num_tiles, r_lanes


def _mcloss_kernel(hT_ref, yT_ref, r_ref, mcm_ref, sums_ref, *, lane_chunk):
    """One batch tile, transposed layout.

    hT_ref, yT_ref : (c_pad, tile_n)        logits / binary targets
    r_ref          : (c_pad, c_pad, r_lanes) r_ref[j, i, :] = R[i, j]
    mcm_ref        : (c_pad, tile_n)        MCM-constrained probabilities (output)
    sums_ref       : (1, 4*c_pad, 128)      per-tile partial sums, rows =
                                            [bce log-sum | intersection | sum(h*) | sum(y)]
    """
    c_pad, tile_n = hT_ref.shape
    n_chunks = tile_n // lane_chunk
    n_fold = lane_chunk // 128

    def fold128(x):
        # (c_pad, lane_chunk) -> (c_pad, 128): static 128-aligned lane slices (free,
        # vreg-aligned) + VALU adds.  The final 128-lane sum happens in the wrapper.
        acc = x[:, 0:128]
        for g in range(1, n_fold):
            acc = acc + x[:, g * 128:(g + 1) * 128]
        return acc

    def chunk_body(ci, carry):
        bce_a, int_a, hs_a, ys_a = carry
        off = ci * lane_chunk
        if not isinstance(off, int):
            off = pl.multiple_of(off, lane_chunk)

        y_c = yT_ref[:, pl.ds(off, lane_chunk)].astype(jnp.float32)
        s = jax.nn.sigmoid(hT_ref[:, pl.ds(off, lane_chunk)].astype(jnp.float32))
        sy = s * y_c

        # Streaming running max over classes j (statically unrolled):
        #   a [i, n] = max_j R[i, j] * sigmoid(h[n, j])
        #   am[i, n] = max_j R[i, j] * sigmoid(h[n, j]) * y[n, j]
        # Products are >= 0, so 0 is a valid max identity (keeps pads at exactly 0).
        # 4 VALU ops / class on register-resident (c_pad, lane_chunk) arrays.
        a = jnp.zeros((c_pad, lane_chunk), jnp.float32)
        am = jnp.zeros((c_pad, lane_chunk), jnp.float32)
        for j in range(c_pad):
            r_j = r_ref[j]                                   # (c_pad, r_lanes)
            a = jnp.maximum(a, r_j * s[j:j + 1, :])
            am = jnp.maximum(am, r_j * sy[j:j + 1, :])

        # Unmasked lane-dense store of this chunk of the MCM output.
        mcm_ref[:, pl.ds(off, lane_chunk)] = a.astype(mcm_ref.dtype)

        pos = y_c > 0.0
        # h_star = (1 - y)*mcm + y*mcm_masked  (y is binary -> a select)
        h_star = jnp.where(pos, am, a)
        # Single-log BCE (y binary) with torch.nn.BCELoss's log clamp at -100.
        ll = jnp.maximum(jnp.log(jnp.where(pos, h_star, 1.0 - h_star)), -100.0)

        return (bce_a + fold128(ll),
                int_a + fold128(jnp.where(pos, h_star, 0.0)),   # h_star * y
                hs_a + fold128(h_star),
                ys_a + fold128(y_c))

    zero = jnp.zeros((c_pad, 128), jnp.float32)
    init = (zero, zero, zero, zero)
    if n_chunks == 1:
        bce_a, int_a, hs_a, ys_a = chunk_body(0, init)
    else:
        bce_a, int_a, hs_a, ys_a = lax.fori_loop(0, n_chunks, chunk_body, init)

    # One fused, lane-dense partial-sum slab -> single unmasked store / single DMA.
    sums_ref[0] = jnp.concatenate([bce_a, int_a, hs_a, ys_a], axis=0)


def mcloss(h, y, R, *, add_dice=ADD_DICE):
    """loss, mcm = MCloss(h, y) with ancestry matrix R.  h, y: (N, C); R: (C, C)."""
    N, C = h.shape
    f32 = jnp.float32

    c_pad, lane_chunk, tile_n, n_pad, num_tiles, r_lanes = _plan(N, C)

    # Pad with a huge negative logit -> sigmoid == 0 -> padded rows / classes
    # contribute exactly 0 to mcm, the BCE sums and the Dice sums.
    hT = jnp.full((c_pad, n_pad), _NEG_FILL, f32).at[:C, :N].set(h.astype(f32).T)
    yT = jnp.zeros((c_pad, n_pad), f32).at[:C, :N].set(y.astype(f32).T)
    R_pad = jnp.zeros((c_pad, c_pad), f32).at[:C, :C].set(R.astype(f32))
    # r_rep[j, i, :] = R[i, j], pre-replicated across the lane chunk so the kernel's
    # inner loop needs no lane broadcast for R.
    r_rep = jnp.broadcast_to(R_pad.T[:, :, None], (c_pad, c_pad, r_lanes))

    cost = pl.CostEstimate(
        flops=int(4 * n_pad * c_pad * c_pad + 12 * n_pad * c_pad),
        transcendentals=int(2 * n_pad * c_pad),
        bytes_accessed=int(4 * (3 * n_pad * c_pad + c_pad * c_pad * r_lanes
                                + num_tiles * 4 * c_pad * 128)),
    )

    kernel = functools.partial(_mcloss_kernel, lane_chunk=lane_chunk)

    mcmT, sums = pl.pallas_call(
        kernel,
        grid=(num_tiles,),
        in_specs=[
            pl.BlockSpec((c_pad, tile_n), lambda i: (0, i)),                  # hT
            pl.BlockSpec((c_pad, tile_n), lambda i: (0, i)),                  # yT
            pl.BlockSpec((c_pad, c_pad, r_lanes), lambda i: (0, 0, 0)),       # R (pinned)
        ],
        out_specs=(
            pl.BlockSpec((c_pad, tile_n), lambda i: (0, i)),                  # mcmT
            pl.BlockSpec((1, 4 * c_pad, 128), lambda i: (i, 0, 0)),           # fused sums
        ),
        out_shape=(
            jax.ShapeDtypeStruct((c_pad, n_pad), f32),
            jax.ShapeDtypeStruct((num_tiles, 4 * c_pad, 128), f32),
        ),
        compiler_params=pltpu.CompilerParams(
            dimension_semantics=("parallel",),
            vmem_limit_bytes=32 * 1024 * 1024,
        ),
        cost_estimate=cost,
    )(hT, yT, r_rep)

    # Tiny finalize in plain JAX (keeps the kernel's grid axis fully parallel).
    tot = jnp.sum(sums, axis=(0, 2))                       # (4*c_pad,)
    bce_c = tot[0 * c_pad:0 * c_pad + C]
    inter_c = tot[1 * c_pad:1 * c_pad + C]
    hsum_c = tot[2 * c_pad:2 * c_pad + C]
    ysum_c = tot[3 * c_pad:3 * c_pad + C]

    bce = -jnp.sum(bce_c) / (N * C)                        # BCELoss(reduction='mean')
    card_c = hsum_c + ysum_c
    dice_score = 2.0 * inter_c / jnp.maximum(card_c, 1e-7)  # smp DiceLoss: smooth=0, eps=1e-7
    present = (ysum_c > 0).astype(f32)                     # mask classes absent from target
    dice_loss = jnp.sum((1.0 - dice_score) * present) / C  # mean over classes
    loss = 1.0 * add_dice * dice_loss + bce

    mcm = mcmT[:C, :N].T                                   # back to (N, C)
    return loss, mcm


def mcloss_ref(h, y, R, add_dice=ADD_DICE):
    """Plain-JAX reference matching the PyTorch module (float32)."""
    h = h.astype(jnp.float32)
    y = y.astype(jnp.float32)
    R = R.astype(jnp.float32)
    hs = jax.nn.sigmoid(h)

    def mcm_constraint(x):
        return jnp.max(R[None, :, :] * x[:, None, :], axis=2)

    mcm = mcm_constraint(hs)
    mcm_m = mcm_constraint(hs * y)
    h_star = (1.0 - y) * mcm + y * mcm_m
    log_p = jnp.maximum(jnp.log(h_star), -100.0)
    log_q = jnp.maximum(jnp.log(1.0 - h_star), -100.0)
    bce = -jnp.mean(y * log_p + (1.0 - y) * log_q)
    inter = jnp.sum(h_star * y, axis=0)
    card = jnp.sum(h_star + y, axis=0)
    dice = 2.0 * inter / jnp.maximum(card, 1e-7)
    present = (jnp.sum(y, axis=0) > 0).astype(jnp.float32)
    dice_loss = jnp.mean((1.0 - dice) * present)
    return 1.0 * add_dice * dice_loss + bce, mcm


def _make_inputs(key, N, C):
    k1, k2 = jax.random.split(key)
    h = jax.random.normal(k1, (N, C), dtype=jnp.float32)
    y = jax.random.bernoulli(k2, 0.3, (N, C)).astype(jnp.float32)
    # Deterministic ancestry matrix (synthetic binary-tree hierarchy):
    # R[i, j] = 1 iff class j is class i or a descendant of i.
    Rnp = np.eye(C, dtype=np.float32)
    for j in range(1, C):
        a = j
        while a > 0:
            a = (a - 1) // 2  # parent in the binary tree
            Rnp[a, j] = 1.0
    return h, y, jnp.asarray(Rnp)


if __name__ == "__main__":
    mcloss_jit = jax.jit(mcloss)

    # Small config: batch=8, 16 hierarchical classes.
    h, y, R = _make_inputs(jax.random.PRNGKey(0), 8, 16)
    loss, mcm = mcloss_jit(h, y, R)
    jax.block_until_ready((loss, mcm))
    assert np.isfinite(float(loss)), "loss is not finite"
    assert mcm.shape == (8, 16)
    ref_loss, ref_mcm = mcloss_ref(h, y, R)
    np.testing.assert_allclose(np.asarray(mcm), np.asarray(ref_mcm),
                               rtol=1e-4, atol=1e-5)
    np.testing.assert_allclose(float(loss), float(ref_loss),
                               rtol=5e-4, atol=1e-5)

    # Second config exercising multi-tile / multi-lane-chunk / padded-class paths.
    h2, y2, R2 = _make_inputs(jax.random.PRNGKey(1), 600, 11)
    loss2, mcm2 = mcloss_jit(h2, y2, R2)
    jax.block_until_ready((loss2, mcm2))
    ref_loss2, ref_mcm2 = mcloss_ref(h2, y2, R2)
    np.testing.assert_allclose(np.asarray(mcm2), np.asarray(ref_mcm2),
                               rtol=1e-4, atol=1e-5)
    np.testing.assert_allclose(float(loss2), float(ref_loss2),
                               rtol=5e-4, atol=1e-5)

    print("KERNEL_OK")
</pallas_src>

<mosaic_0001>
module attributes {stable_mosaic.version = 11 : i64} {
  func.func @_mcloss_kernel(%arg0: i32, %arg1: memref<16x128xf32, #tpu.memory_space<vmem>>, %arg2: memref<16x128xf32, #tpu.memory_space<vmem>>, %arg3: memref<16x16x128xf32, #tpu.memory_space<vmem>>, %arg4: memref<16x128xf32, #tpu.memory_space<vmem>>, %arg5: memref<1x64x128xf32, #tpu.memory_space<vmem>>) attributes {dimension_semantics = [#tpu.dimension_semantics<parallel>], iteration_bounds = array<i64: 1>, scalar_prefetch = 0 : i64, scratch_operands = 0 : i64, tpu.core_type = #tpu.core_type<tc>, window_params = [{transform_indices = @transform_0, window_bounds = array<i64: 16, 128>}, {transform_indices = @transform_1, window_bounds = array<i64: 16, 128>}, {pipeline_mode = #tpu.pipeline_mode<synchronous>, transform_indices = @transform_2, window_bounds = array<i64: 16, 16, 128>}, {transform_indices = @transform_3, window_bounds = array<i64: 16, 128>}, {transform_indices = @transform_4, window_bounds = array<i64: 1, 64, 128>}]} {
    %cst = arith.constant 0.000000e+00 : f32
    %0 = vector.broadcast %cst : f32 to vector<16x128xf32>
    %c0 = arith.constant 0 : index
    %c0_0 = arith.constant 0 : index
    %1 = vector.load %arg2[%c0, %c0_0] : memref<16x128xf32, #tpu.memory_space<vmem>>, vector<16x128xf32>
    %c0_1 = arith.constant 0 : index
    %c0_2 = arith.constant 0 : index
    %2 = vector.load %arg1[%c0_1, %c0_2] : memref<16x128xf32, #tpu.memory_space<vmem>>, vector<16x128xf32>
    %3 = arith.negf %2 : vector<16x128xf32>
    %4 = math.exp %3 : vector<16x128xf32>
    %cst_3 = arith.constant 1.000000e+00 : f32
    %5 = vector.broadcast %cst_3 : f32 to vector<16x128xf32>
    %6 = arith.addf %5, %4 : vector<16x128xf32>
    %7 = arith.divf %5, %6 : vector<16x128xf32>
    %8 = arith.mulf %7, %1 : vector<16x128xf32>
    %cst_4 = arith.constant 0.000000e+00 : f32
    %9 = vector.broadcast %cst_4 : f32 to vector<16x128xf32>
    %cst_5 = arith.constant 0.000000e+00 : f32
    %10 = vector.broadcast %cst_5 : f32 to vector<16x128xf32>
    %c0_6 = arith.constant 0 : index
    %c0_7 = arith.constant 0 : index
    %c0_8 = arith.constant 0 : index
    %11 = vector.load %arg3[%c0_6, %c0_7, %c0_8] : memref<16x16x128xf32, #tpu.memory_space<vmem>>, vector<1x16x128xf32>
    %12 = vector.shape_cast %11 : vector<1x16x128xf32> to vector<16x128xf32>
    %13 = vector.extract_strided_slice %7 {offsets = [0, 0], sizes = [1, 128], strides = [1, 1]} : vector<16x128xf32> to vector<1x128xf32>
    %14 = vector.broadcast %13 : vector<1x128xf32> to vector<16x128xf32>
    %15 = arith.mulf %12, %14 : vector<16x128xf32>
    %16 = arith.maximumf %9, %15 : vector<16x128xf32>
    %17 = vector.extract_strided_slice %8 {offsets = [0, 0], sizes = [1, 128], strides = [1, 1]} : vector<16x128xf32> to vector<1x128xf32>
    %18 = vector.broadcast %17 : vector<1x128xf32> to vector<16x128xf32>
    %19 = arith.mulf %12, %18 : vector<16x128xf32>
    %20 = arith.maximumf %10, %19 : vector<16x128xf32>
    %c1 = arith.constant 1 : index
    %c0_9 = arith.constant 0 : index
    %c0_10 = arith.constant 0 : index
    %21 = vector.load %arg3[%c1, %c0_9, %c0_10] : memref<16x16x128xf32, #tpu.memory_space<vmem>>, vector<1x16x128xf32>
    %22 = vector.shape_cast %21 : vector<1x16x128xf32> to vector<16x128xf32>
    %23 = vector.extract_strided_slice %7 {offsets = [1, 0], sizes = [1, 128], strides = [1, 1]} : vector<16x128xf32> to vector<1x128xf32>
    %24 = vector.broadcast %23 : vector<1x128xf32> to vector<16x128xf32>
    %25 = arith.mulf %22, %24 : vector<16x128xf32>
    %26 = arith.maximumf %16, %25 : vector<16x128xf32>
    %27 = vector.extract_strided_slice %8 {offsets = [1, 0], sizes = [1, 128], strides = [1, 1]} : vector<16x128xf32> to vector<1x128xf32>
    %28 = vector.broadcast %27 : vector<1x128xf32> to vector<16x128xf32>
    %29 = arith.mulf %22, %28 : vector<16x128xf32>
    %30 = arith.maximumf %20, %29 : vector<16x128xf32>
    %c2 = arith.constant 2 : index
    %c0_11 = arith.constant 0 : index
    %c0_12 = arith.constant 0 : index
    %31 = vector.load %arg3[%c2, %c0_11, %c0_12] : memref<16x16x128xf32, #tpu.memory_space<vmem>>, vector<1x16x128xf32>
    %32 = vector.shape_cast %31 : vector<1x16x128xf32> to vector<16x128xf32>
    %33 = vector.extract_strided_slice %7 {offsets = [2, 0], sizes = [1, 128], strides = [1, 1]} : vector<16x128xf32> to vector<1x128xf32>
    %34 = vector.broadcast %33 : vector<1x128xf32> to vector<16x128xf32>
    %35 = arith.mulf %32, %34 : vector<16x128xf32>
    %36 = arith.maximumf %26, %35 : vector<16x128xf32>
    %37 = vector.extract_strided_slice %8 {offsets = [2, 0], sizes = [1, 128], strides = [1, 1]} : vector<16x128xf32> to vector<1x128xf32>
    %38 = vector.broadcast %37 : vector<1x128xf32> to vector<16x128xf32>
    %39 = arith.mulf %32, %38 : vector<16x128xf32>
    %40 = arith.maximumf %30, %39 : vector<16x128xf32>
    %c3 = arith.constant 3 : index
    %c0_13 = arith.constant 0 : index
    %c0_14 = arith.constant 0 : index
    %41 = vector.load %arg3[%c3, %c0_13, %c0_14] : memref<16x16x128xf32, #tpu.memory_space<vmem>>, vector<1x16x128xf32>
    %42 = vector.shape_cast %41 : vector<1x16x128xf32> to vector<16x128xf32>
    %43 = vector.extract_strided_slice %7 {offsets = [3, 0], sizes = [1, 128], strides = [1, 1]} : vector<16x128xf32> to vector<1x128xf32>
    %44 = vector.broadcast %43 : vector<1x128xf32> to vector<16x128xf32>
    %45 = arith.mulf %42, %44 : vector<16x128xf32>
    %46 = arith.maximumf %36, %45 : vector<16x128xf32>
    %47 = vector.extract_strided_slice %8 {offsets = [3, 0], sizes = [1, 128], strides = [1, 1]} : vector<16x128xf32> to vector<1x128xf32>
    %48 = vector.broadcast %47 : vector<1x128xf32> to vector<16x128xf32>
    %49 = arith.mulf %42, %48 : vector<16x128xf32>
    %50 = arith.maximumf %40, %49 : vector<16x128xf32>
    %c4 = arith.constant 4 : index
    %c0_15 = arith.constant 0 : index
    %c0_16 = arith.constant 0 : index
    %51 = vector.load %arg3[%c4, %c0_15, %c0_16] : memref<16x16x128xf32, #tpu.memory_space<vmem>>, vector<1x16x128xf32>
    %52 = vector.shape_cast %51 : vector<1x16x128xf32> to vector<16x128xf32>
    %53 = vector.extract_strided_slice %7 {offsets = [4, 0], sizes = [1, 128], strides = [1, 1]} : vector<16x128xf32> to vector<1x128xf32>
    %54 = vector.broadcast %53 : vector<1x128xf32> to vector<16x128xf32>
    %55 = arith.mulf %52, %54 : vector<16x128xf32>
    %56 = arith.maximumf %46, %55 : vector<16x128xf32>
    %57 = vector.extract_strided_slice %8 {offsets = [4, 0], sizes = [1, 128], strides = [1, 1]} : vector<16x128xf32> to vector<1x128xf32>
    %58 = vector.broadcast %57 : vector<1x128xf32> to vector<16x128xf32>
    %59 = arith.mulf %52, %58 : vector<16x128xf32>
    %60 = arith.maximumf %50, %59 : vector<16x128xf32>
    %c5 = arith.constant 5 : index
    %c0_17 = arith.constant 0 : index
    %c0_18 = arith.constant 0 : index
    %61 = vector.load %arg3[%c5, %c0_17, %c0_18] : memref<16x16x128xf32, #tpu.memory_space<vmem>>, vector<1x16x128xf32>
    %62 = vector.shape_cast %61 : vector<1x16x128xf32> to vector<16x128xf32>
    %63 = vector.extract_strided_slice %7 {offsets = [5, 0], sizes = [1, 128], strides = [1, 1]} : vector<16x128xf32> to vector<1x128xf32>
    %64 = vector.broadcast %63 : vector<1x128xf32> to vector<16x128xf32>
    %65 = arith.mulf %62, %64 : vector<16x128xf32>
    %66 = arith.maximumf %56, %65 : vector<16x128xf32>
    %67 = vector.extract_strided_slice %8 {offsets = [5, 0], sizes = [1, 128], strides = [1, 1]} : vector<16x128xf32> to vector<1x128xf32>
    %68 = vector.broadcast %67 : vector<1x128xf32> to vector<16x128xf32>
    %69 = arith.mulf %62, %68 : vector<16x128xf32>
    %70 = arith.maximumf %60, %69 : vector<16x128xf32>
    %c6 = arith.constant 6 : index
    %c0_19 = arith.constant 0 : index
    %c0_20 = arith.constant 0 : index
    %71 = vector.load %arg3[%c6, %c0_19, %c0_20] : memref<16x16x128xf32, #tpu.memory_space<vmem>>, vector<1x16x128xf32>
    %72 = vector.shape_cast %71 : vector<1x16x128xf32> to vector<16x128xf32>
    %73 = vector.extract_strided_slice %7 {offsets = [6, 0], sizes = [1, 128], strides = [1, 1]} : vector<16x128xf32> to vector<1x128xf32>
    %74 = vector.broadcast %73 : vector<1x128xf32> to vector<16x128xf32>
    %75 = arith.mulf %72, %74 : vector<16x128xf32>
    %76 = arith.maximumf %66, %75 : vector<16x128xf32>
    %77 = vector.extract_strided_slice %8 {offsets = [6, 0], sizes = [1, 128], strides = [1, 1]} : vector<16x128xf32> to vector<1x128xf32>
    %78 = vector.broadcast %77 : vector<1x128xf32> to vector<16x128xf32>
    %79 = arith.mulf %72, %78 : vector<16x128xf32>
    %80 = arith.maximumf %70, %79 : vector<16x128xf32>
    %c7 = arith.constant 7 : index
    %c0_21 = arith.constant 0 : index
    %c0_22 = arith.constant 0 : index
    %81 = vector.load %arg3[%c7, %c0_21, %c0_22] : memref<16x16x128xf32, #tpu.memory_space<vmem>>, vector<1x16x128xf32>
    %82 = vector.shape_cast %81 : vector<1x16x128xf32> to vector<16x128xf32>
    %83 = vector.extract_strided_slice %7 {offsets = [7, 0], sizes = [1, 128], strides = [1, 1]} : vector<16x128xf32> to vector<1x128xf32>
    %84 = vector.broadcast %83 : vector<1x128xf32> to vector<16x128xf32>
    %85 = arith.mulf %82, %84 : vector<16x128xf32>
    %86 = arith.maximumf %76, %85 : vector<16x128xf32>
    %87 = vector.extract_strided_slice %8 {offsets = [7, 0], sizes = [1, 128], strides = [1, 1]} : vector<16x128xf32> to vector<1x128xf32>
    %88 = vector.broadcast %87 : vector<1x128xf32> to vector<16x128xf32>
    %89 = arith.mulf %82, %88 : vector<16x128xf32>
    %90 = arith.maximumf %80, %89 : vector<16x128xf32>
    %c8 = arith.constant 8 : index
    %c0_23 = arith.constant 0 : index
    %c0_24 = arith.constant 0 : index
    %91 = vector.load %arg3[%c8, %c0_23, %c0_24] : memref<16x16x128xf32, #tpu.memory_space<vmem>>, vector<1x16x128xf32>
    %92 = vector.shape_cast %91 : vector<1x16x128xf32> to vector<16x128xf32>
    %93 = vector.extract_strided_slice %7 {offsets = [8, 0], sizes = [1, 128], strides = [1, 1]} : vector<16x128xf32> to vector<1x128xf32>
    %94 = vector.broadcast %93 : vector<1x128xf32> to vector<16x128xf32>
    %95 = arith.mulf %92, %94 : vector<16x128xf32>
    %96 = arith.maximumf %86, %95 : vector<16x128xf32>
    %97 = vector.extract_strided_slice %8 {offsets = [8, 0], sizes = [1, 128], strides = [1, 1]} : vector<16x128xf32> to vector<1x128xf32>
    %98 = vector.broadcast %97 : vector<1x128xf32> to vector<16x128xf32>
    %99 = arith.mulf %92, %98 : vector<16x128xf32>
    %100 = arith.maximumf %90, %99 : vector<16x128xf32>
    %c9 = arith.constant 9 : index
    %c0_25 = arith.constant 0 : index
    %c0_26 = arith.constant 0 : index
    %101 = vector.load %arg3[%c9, %c0_25, %c0_26] : memref<16x16x128xf32, #tpu.memory_space<vmem>>, vector<1x16x128xf32>
    %102 = vector.shape_cast %101 : vector<1x16x128xf32> to vector<16x128xf32>
    %103 = vector.extract_strided_slice %7 {offsets = [9, 0], sizes = [1, 128], strides = [1, 1]} : vector<16x128xf32> to vector<1x128xf32>
    %104 = vector.broadcast %103 : vector<1x128xf32> to vector<16x128xf32>
    %105 = arith.mulf %102, %104 : vector<16x128xf32>
    %106 = arith.maximumf %96, %105 : vector<16x128xf32>
    %107 = vector.extract_strided_slice %8 {offsets = [9, 0], sizes = [1, 128], strides = [1, 1]} : vector<16x128xf32> to vector<1x128xf32>
    %108 = vector.broadcast %107 : vector<1x128xf32> to vector<16x128xf32>
    %109 = arith.mulf %102, %108 : vector<16x128xf32>
    %110 = arith.maximumf %100, %109 : vector<16x128xf32>
    %c10 = arith.constant 10 : index
    %c0_27 = arith.constant 0 : index
    %c0_28 = arith.constant 0 : index
    %111 = vector.load %arg3[%c10, %c0_27, %c0_28] : memref<16x16x128xf32, #tpu.memory_space<vmem>>, vector<1x16x128xf32>
    %112 = vector.shape_cast %111 : vector<1x16x128xf32> to vector<16x128xf32>
    %113 = vector.extract_strided_slice %7 {offsets = [10, 0], sizes = [1, 128], strides = [1, 1]} : vector<16x128xf32> to vector<1x128xf32>
    %114 = vector.broadcast %113 : vector<1x128xf32> to vector<16x128xf32>
    %115 = arith.mulf %112, %114 : vector<16x128xf32>
    %116 = arith.maximumf %106, %115 : vector<16x128xf32>
    %117 = vector.extract_strided_slice %8 {offsets = [10, 0], sizes = [1, 128], strides = [1, 1]} : vector<16x128xf32> to vector<1x128xf32>
    %118 = vector.broadcast %117 : vector<1x128xf32> to vector<16x128xf32>
    %119 = arith.mulf %112, %118 : vector<16x128xf32>
    %120 = arith.maximumf %110, %119 : vector<16x128xf32>
    %c11 = arith.constant 11 : index
    %c0_29 = arith.constant 0 : index
    %c0_30 = arith.constant 0 : index
    %121 = vector.load %arg3[%c11, %c0_29, %c0_30] : memref<16x16x128xf32, #tpu.memory_space<vmem>>, vector<1x16x128xf32>
    %122 = vector.shape_cast %121 : vector<1x16x128xf32> to vector<16x128xf32>
    %123 = vector.extract_strided_slice %7 {offsets = [11, 0], sizes = [1, 128], strides = [1, 1]} : vector<16x128xf32> to vector<1x128xf32>
    %124 = vector.broadcast %123 : vector<1x128xf32> to vector<16x128xf32>
    %125 = arith.mulf %122, %124 : vector<16x128xf32>
    %126 = arith.maximumf %116, %125 : vector<16x128xf32>
    %127 = vector.extract_strided_slice %8 {offsets = [11, 0], sizes = [1, 128], strides = [1, 1]} : vector<16x128xf32> to vector<1x128xf32>
    %128 = vector.broadcast %127 : vector<1x128xf32> to vector<16x128xf32>
    %129 = arith.mulf %122, %128 : vector<16x128xf32>
    %130 = arith.maximumf %120, %129 : vector<16x128xf32>
    %c12 = arith.constant 12 : index
    %c0_31 = arith.constant 0 : index
    %c0_32 = arith.constant 0 : index
    %131 = vector.load %arg3[%c12, %c0_31, %c0_32] : memref<16x16x128xf32, #tpu.memory_space<vmem>>, vector<1x16x128xf32>
    %132 = vector.shape_cast %131 : vector<1x16x128xf32> to vector<16x128xf32>
    %133 = vector.extract_strided_slice %7 {offsets = [12, 0], sizes = [1, 128], strides = [1, 1]} : vector<16x128xf32> to vector<1x128xf32>
    %134 = vector.broadcast %133 : vector<1x128xf32> to vector<16x128xf32>
    %135 = arith.mulf %132, %134 : vector<16x128xf32>
    %136 = arith.maximumf %126, %135 : vector<16x128xf32>
    %137 = vector.extract_strided_slice %8 {offsets = [12, 0], sizes = [1, 128], strides = [1, 1]} : vector<16x128xf32> to vector<1x128xf32>
    %138 = vector.broadcast %137 : vector<1x128xf32> to vector<16x128xf32>
    %139 = arith.mulf %132, %138 : vector<16x128xf32>
    %140 = arith.maximumf %130, %139 : vector<16x128xf32>
    %c13 = arith.constant 13 : index
    %c0_33 = arith.constant 0 : index
    %c0_34 = arith.constant 0 : index
    %141 = vector.load %arg3[%c13, %c0_33, %c0_34] : memref<16x16x128xf32, #tpu.memory_space<vmem>>, vector<1x16x128xf32>
    %142 = vector.shape_cast %141 : vector<1x16x128xf32> to vector<16x128xf32>
    %143 = vector.extract_strided_slice %7 {offsets = [13, 0], sizes = [1, 128], strides = [1, 1]} : vector<16x128xf32> to vector<1x128xf32>
    %144 = vector.broadcast %143 : vector<1x128xf32> to vector<16x128xf32>
    %145 = arith.mulf %142, %144 : vector<16x128xf32>
    %146 = arith.maximumf %136, %145 : vector<16x128xf32>
    %147 = vector.extract_strided_slice %8 {offsets = [13, 0], sizes = [1, 128], strides = [1, 1]} : vector<16x128xf32> to vector<1x128xf32>
    %148 = vector.broadcast %147 : vector<1x128xf32> to vector<16x128xf32>
    %149 = arith.mulf %142, %148 : vector<16x128xf32>
    %150 = arith.maximumf %140, %149 : vector<16x128xf32>
    %c14 = arith.constant 14 : index
    %c0_35 = arith.constant 0 : index
    %c0_36 = arith.constant 0 : index
    %151 = vector.load %arg3[%c14, %c0_35, %c0_36] : memref<16x16x128xf32, #tpu.memory_space<vmem>>, vector<1x16x128xf32>
    %152 = vector.shape_cast %151 : vector<1x16x128xf32> to vector<16x128xf32>
    %153 = vector.extract_strided_slice %7 {offsets = [14, 0], sizes = [1, 128], strides = [1, 1]} : vector<16x128xf32> to vector<1x128xf32>
    %154 = vector.broadcast %153 : vector<1x128xf32> to vector<16x128xf32>
    %155 = arith.mulf %152, %154 : vector<16x128xf32>
    %156 = arith.maximumf %146, %155 : vector<16x128xf32>
    %157 = vector.extract_strided_slice %8 {offsets = [14, 0], sizes = [1, 128], strides = [1, 1]} : vector<16x128xf32> to vector<1x128xf32>
    %158 = vector.broadcast %157 : vector<1x128xf32> to vector<16x128xf32>
    %159 = arith.mulf %152, %158 : vector<16x128xf32>
    %160 = arith.maximumf %150, %159 : vector<16x128xf32>
    %c15 = arith.constant 15 : index
    %c0_37 = arith.constant 0 : index
    %c0_38 = arith.constant 0 : index
    %161 = vector.load %arg3[%c15, %c0_37, %c0_38] : memref<16x16x128xf32, #tpu.memory_space<vmem>>, vector<1x16x128xf32>
    %162 = vector.shape_cast %161 : vector<1x16x128xf32> to vector<16x128xf32>
    %163 = vector.extract_strided_slice %7 {offsets = [15, 0], sizes = [1, 128], strides = [1, 1]} : vector<16x128xf32> to vector<1x128xf32>
    %164 = vector.broadcast %163 : vector<1x128xf32> to vector<16x128xf32>
    %165 = arith.mulf %162, %164 : vector<16x128xf32>
    %166 = arith.maximumf %156, %165 : vector<16x128xf32>
    %167 = vector.extract_strided_slice %8 {offsets = [15, 0], sizes = [1, 128], strides = [1, 1]} : vector<16x128xf32> to vector<1x128xf32>
    %168 = vector.broadcast %167 : vector<1x128xf32> to vector<16x128xf32>
    %169 = arith.mulf %162, %168 : vector<16x128xf32>
    %170 = arith.maximumf %160, %169 : vector<16x128xf32>
    %c0_39 = arith.constant 0 : index
    %c0_40 = arith.constant 0 : index
    %171 = vector.load %arg4[%c0_39, %c0_40] : memref<16x128xf32, #tpu.memory_space<vmem>>, vector<16x128xf32>
    tpu.vector_store %arg4[%c0_39, %c0_40], %166 {strides = array<i32>} : memref<16x128xf32, #tpu.memory_space<vmem>>, vector<16x128xf32>,
    %cst_41 = arith.constant 0.000000e+00 : f32
    %172 = vector.broadcast %cst_41 : f32 to vector<16x128xf32>
    %173 = arith.cmpf ogt, %1, %172 : vector<16x128xf32>
    %174 = arith.select %173, %170, %166 : vector<16x128xi1>, vector<16x128xf32>
    %cst_42 = arith.constant 1.000000e+00 : f32
    %175 = vector.broadcast %cst_42 : f32 to vector<16x128xf32>
    %176 = arith.subf %175, %174 : vector<16x128xf32>
    %177 = arith.select %173, %174, %176 : vector<16x128xi1>, vector<16x128xf32>
    %178 = math.log %177 : vector<16x128xf32>
    %cst_43 = arith.constant -1.000000e+02 : f32
    %179 = vector.broadcast %cst_43 : f32 to vector<16x128xf32>
    %180 = arith.maximumf %178, %179 : vector<16x128xf32>
    %181 = arith.addf %0, %180 : vector<16x128xf32>
    %cst_44 = arith.constant 0.000000e+00 : f32
    %182 = vector.broadcast %cst_44 : f32 to vector<16x128xf32>
    %183 = arith.select %173, %174, %182 : vector<16x128xi1>, vector<16x128xf32>
    %184 = arith.addf %0, %183 : vector<16x128xf32>
    %185 = arith.addf %0, %174 : vector<16x128xf32>
    %186 = arith.addf %0, %1 : vector<16x128xf32>
    %187 = tpu.concatenate %181, %184, %185, %186 in 0 : vector<16x128xf32>, vector<16x128xf32>, vector<16x128xf32>, vector<16x128xf32> -> vector<64x128xf32>
    %c0_45 = arith.constant 0 : index
    %c0_46 = arith.constant 0 : index
    %c0_47 = arith.constant 0 : index
    %188 = vector.load %arg5[%c0_45, %c0_46, %c0_47] : memref<1x64x128xf32, #tpu.memory_space<vmem>>, vector<1x64x128xf32>
    %189 = vector.shape_cast %188 : vector<1x64x128xf32> to vector<64x128xf32>
    %190 = vector.shape_cast %187 : vector<64x128xf32> to vector<1x64x128xf32>
    tpu.vector_store %arg5[%c0_45, %c0_46, %c0_47], %190 {strides = array<i32>} : memref<1x64x128xf32, #tpu.memory_space<vmem>>, vector<1x64x128xf32>,
    return
  }
  func.func @transform_0(%arg0: i32) -> (i32, i32) {
    %c0_i32 = arith.constant 0 : i32
    %c0_i32_0 = arith.constant 0 : i32
    return %c0_i32, %arg0 : i32, i32
  }
  func.func @transform_1(%arg0: i32) -> (i32, i32) {
    %c0_i32 = arith.constant 0 : i32
    %c0_i32_0 = arith.constant 0 : i32
    return %c0_i32, %arg0 : i32, i32
  }
  func.func @transform_2(%arg0: i32) -> (i32, i32, i32) {
    %c0_i32 = arith.constant 0 : i32
    %c0_i32_0 = arith.constant 0 : i32
    %c0_i32_1 = arith.constant 0 : i32
    %c0_i32_2 = arith.constant 0 : i32
    return %c0_i32, %c0_i32_0, %c0_i32_1 : i32, i32, i32
  }
  func.func @transform_3(%arg0: i32) -> (i32, i32) {
    %c0_i32 = arith.constant 0 : i32
    %c0_i32_0 = arith.constant 0 : i32
    return %c0_i32, %arg0 : i32, i32
  }
  func.func @transform_4(%arg0: i32) -> (i32, i32, i32) {
    %c0_i32 = arith.constant 0 : i32
    %c0_i32_0 = arith.constant 0 : i32
    %c0_i32_1 = arith.constant 0 : i32
    return %arg0, %c0_i32, %c0_i32_0 : i32, i32, i32
  }
}

</mosaic_0001>

<bundles_post_ra>
// kernel: mcloss.1
= control target key start
LH: loop header
LB: loop body
LE: loop exit
PB: predicated region body
PF: predicated region fallthrough
CT: control target
= control target key end

     0   :  { %v36_v10 = vlaneseq  ;;  %s793_s0 = inlined_call_operand.vmem [shape: f32[16,128], index: 0, kind: input, shape index: {}]   ;;  %s794_s1 = inlined_call_operand.vmem [shape: f32[16,128], index: 1, kind: input, shape index: {}]   ;;  %s795_s4 = inlined_call_operand.vmem [shape: f32[1,64,128], index: 4, kind: output, shape index: {1}]   ;;  %s796_s2 = inlined_call_operand.vmem [shape: f32[16,16,128], index: 2, kind: input, shape index: {}]   ;;  %s797_s3 = inlined_call_operand.vmem [shape: f32[16,128], index: 3, kind: output, shape index: {0}]  }
   0x1   :  { %v451_v0 = vld [vmem:[%s794_s1] sm:$0xff]  ;;  %v456_v1 = vld [vmem:[%s794_s1 + $0x8] sm:$0xff]  ;;  %v381_v18 = vld [vmem:[%s796_s2 + $0x10] sm:$0xff] }
   0x2   :  { %v18_v2 = vld [vmem:[%s793_s0] sm:$0xff]  ;;  %v19_v3 = vld [vmem:[%s793_s0 + $0x8] sm:$0xff]  ;;  %369 = vst [vmem:[%s795_s4 + $0x30] sm:$0xff] %v451_v0  ;;  %370 = vst [vmem:[%s795_s4 + $0x38] sm:$0xff] %v456_v1  ;;  %v37_v11 = vshrl.u32 %v36_v10, 7  ;;  %vm339_vm0 = vcmp.gt.f32.partialorder %v451_v0, 0.0 }
   0x3   :  { %v379_v4 = vmul.f32 -1.442695, %v18_v2  ;;  %v380_v5 = vmul.f32 -1.442695, %v19_v3  ;;  %v34_v17 = vld [vmem:[%s796_s2] sm:$0xff]  ;;  %v385_v33 = vld [vmem:[%s796_s2 + $0x30] sm:$0xff] }
   0x4   :  { %v38_v12 = vsub.s32 0, %v37_v11  ;;  %v472_v13 = vsub.s32 1, %v37_v11  ;;  %v474_v14 = vsub.s32 2, %v37_v11  ;;  %v476_v15 = vsub.s32 3, %v37_v11  ;;  %v383_v24 = vld [vmem:[%s796_s2 + $0x20] sm:$0xff]  ;;  %v389_v52 = vld [vmem:[%s796_s2 + $0x50] sm:$0xff] }
   0x5   :  { %411 = vpow2.f32 %v379_v4  ;;  %v484_v19 = vsub.s32 4, %v37_v11  ;;  %v501_v26 = vsub.s32 5, %v37_v11  ;;  %v503_v27 = vsub.s32 6, %v37_v11  ;;  %v387_v42 = vld [vmem:[%s796_s2 + $0x40] sm:$0xff]  ;;  %v393_v60 = vld [vmem:[%s796_s2 + $0x70] sm:$0xff] }
   0x6   :  { %413 = vpow2.f32 %v380_v5  ;;  %v526_v37 = vsub.s32 7, %v37_v11  ;;  %v391_v57 = vld [vmem:[%s796_s2 + $0x60] sm:$0xff]  ;;  %vm340_vm1 = vcmp.gt.f32.partialorder %v456_v1, 0.0 }
   0xf   :  { %v412_v6 = vpop.eup %411 }
  0x10   :  { %v414_v7 = vpop.eup %413  ;;  %v26_v8 = vadd.f32 1.0, %v412_v6 }
  0x11   :  { %v27_v9 = vadd.f32 1.0, %v414_v7 }
  0x12   :  { %415 = vrcp.f32 %v26_v8 }
  0x13   :  { %417 = vrcp.f32 %v27_v9 }
  0x1c   :  { %v416_v16 = vpop.eup %415 }
  0x1d   :  { %v32_v20 = vmul.f32 %v416_v16, %v451_v0  ;;  %v487_v21 = vrot.slane %v416_v16, %v38_v12  ;;  %v490_v22 = vrot.slane %v416_v16, %v472_v13  ;;  %v493_v23 = vrot.slane %v416_v16, %v474_v14  ;;  %v505_v28 = vpop.eup %417 }
  0x1e   :  { %v499_v25 = vrot.slane %v416_v16, %v476_v15  ;;  %v524_v36 = vrot.slane %v416_v16, %v484_v19  ;;  %v536_v43 = vmul.f32 %v505_v28, %v456_v1  ;;  %v540_v45 = vrot.slane %v416_v16, %v501_v26 }
  0x1f   :  { %v40_v29 = vmul.f32 %v487_v21, %v34_v17  ;;  %v508_v30 = vrot.slane %v32_v20, %v38_v12  ;;  %v59_v31 = vmul.f32 %v381_v18, %v490_v22  ;;  %v512_v32 = vrot.slane %v32_v20, %v472_v13 }
  0x20   :  { %v518_v34 = vrot.slane %v32_v20, %v474_v14  ;;  %v521_v35 = vrot.slane %v32_v20, %v476_v15  ;;  %v78_v41 = vmul.f32 %v383_v24, %v493_v23  ;;  %v97_v44 = vmul.f32 %v385_v33, %v499_v25 }
  0x21   :  { %v42_v38 = vmax.f32 %v40_v29, 0.0  ;;  %v48_v39 = vmul.f32 %v508_v30, %v34_v17  ;;  %v67_v40 = vmul.f32 %v381_v18, %v512_v32  ;;  %v544_v49 = vrot.slane %v32_v20, %v484_v19 }
  0x22   :  { %v86_v48 = vmul.f32 %v383_v24, %v518_v34  ;;  %v105_v50 = vmul.f32 %v385_v33, %v521_v35  ;;  %v116_v51 = vmul.f32 %v387_v42, %v524_v36  ;;  %v552_v53 = vrot.slane %v32_v20, %v501_v26  ;;  %v399_v33 = vld [vmem:[%s796_s2 + $0xa0] sm:$0xff] }
  0x23   :  { %v50_v46 = vmax.f32 %v48_v39, 0.0  ;;  %v61_v47 = vmax.f32 %v42_v38, %v59_v31  ;;  %v555_v54 = vrot.slane %v416_v16, %v503_v27  ;;  %v561_v58 = vrot.slane %v32_v20, %v503_v27  ;;  %v397_v31 = vld [vmem:[%s796_s2 + $0x90] sm:$0xff] }
  0x24   :  { %v564_v59 = vrot.slane %v416_v16, %v526_v37  ;;  %v570_v61 = vrot.slane %v32_v20, %v526_v37  ;;  %v124_v2 = vmul.f32 %v387_v42, %v544_v49  ;;  %v135_v3 = vmul.f32 %v389_v52, %v540_v45  ;;  %v395_v16 = vld [vmem:[%s796_s2 + $0x80] sm:$0xff] }
  0x25   :  { %v69_v55 = vmax.f32 %v50_v46, %v67_v40  ;;  %v80_v56 = vmax.f32 %v61_v47, %v78_v41  ;;  %v143_v4 = vmul.f32 %v389_v52, %v552_v53  ;;  %v154_v5 = vmul.f32 %v391_v57, %v555_v54  ;;  %v401_v41 = vld [vmem:[%s796_s2 + $0xb0] sm:$0xff]  ;;  %v403_v47 = vld [vmem:[%s796_s2 + $0xc0] sm:$0xff] }
  0x26   :  { %v577_v6 = vrot.slane %v505_v28, %v38_v12  ;;  %v580_v7 = vrot.slane %v536_v43, %v38_v12  ;;  %v162_v10 = vmul.f32 %v391_v57, %v561_v58  ;;  %v173_v11 = vmul.f32 %v393_v60, %v564_v59 }
  0x27   :  { %v88_v62 = vmax.f32 %v69_v55, %v86_v48  ;;  %v99_v63 = vmax.f32 %v80_v56, %v97_v44  ;;  %v181_v17 = vmul.f32 %v393_v60, %v570_v61  ;;  %v590_v18 = vrot.slane %v505_v28, %v472_v13  ;;  %v405_v56 = vld [vmem:[%s796_s2 + $0xd0] sm:$0xff] }
  0x28   :  { %v594_v12 = vrot.slane %v536_v43, %v472_v13  ;;  %v598_v20 = vrot.slane %v505_v28, %v474_v14  ;;  %v608_v38 = vrot.slane %v536_v43, %v474_v14  ;;  %v612_v13 = vrot.slane %v505_v28, %v476_v15 }
  0x29   :  { %v107_v8 = vmax.f32 %v88_v62, %v105_v50  ;;  %v118_v9 = vmax.f32 %v99_v63, %v116_v51  ;;  %v192_v39 = vmul.f32 %v395_v16, %v577_v6  ;;  %v200_v40 = vmul.f32 %v395_v16, %v580_v7 }
  0x2a   :  { %v621_v42 = vrot.slane %v536_v43, %v476_v15  ;;  %v625_v14 = vrot.slane %v505_v28, %v484_v19  ;;  %v632_v48 = vrot.slane %v536_v43, %v484_v19  ;;  %v636_v50 = vrot.slane %v505_v28, %v501_v26  ;;  %v35_v15 = vld [vmem:[%s796_s2 + $0x8] sm:$0xff] }
  0x2b   :  { %v126_v24 = vmax.f32 %v107_v8, %v124_v2  ;;  %v137_v29 = vmax.f32 %v118_v9, %v135_v3  ;;  %v211_v51 = vmul.f32 %v397_v31, %v590_v18  ;;  %v219_v52 = vmul.f32 %v397_v31, %v594_v12  ;;  %v382_v2 = vld [vmem:[%s796_s2 + $0x18] sm:$0xff] }
  0x2c   :  { %v230_v55 = vmul.f32 %v399_v33, %v598_v20  ;;  %v649_v19 = vrot.slane %v536_v43, %v501_v26  ;;  %v238_v62 = vmul.f32 %v399_v33, %v608_v38  ;;  %v249_v63 = vmul.f32 %v401_v41, %v612_v13  ;;  %v384_v26 = vld [vmem:[%s796_s2 + $0x28] sm:$0xff] }
  0x2d   :  { %v145_v44 = vmax.f32 %v126_v24, %v143_v4  ;;  %v156_v46 = vmax.f32 %v137_v29, %v154_v5  ;;  %v257_v3 = vmul.f32 %v401_v41, %v621_v42  ;;  %v268_v4 = vmul.f32 %v403_v47, %v625_v14  ;;  %v386_v24 = vld [vmem:[%s796_s2 + $0x38] sm:$0xff] }
  0x2e   :  { %v41_v5 = vmul.f32 %v487_v21, %v35_v15  ;;  %v49_v8 = vmul.f32 %v508_v30, %v35_v15  ;;  %v287_v16 = vmul.f32 %v405_v56, %v636_v50  ;;  %v295_v29 = vmul.f32 %v405_v56, %v649_v19 }
  0x2f   :  { %v164_v57 = vmax.f32 %v145_v44, %v162_v10  ;;  %v175_v60 = vmax.f32 %v156_v46, %v173_v11  ;;  %v276_v11 = vmul.f32 %v403_v47, %v632_v48  ;;  %v60_v30 = vmul.f32 %v382_v2, %v490_v22 }
  0x30   :  { %v43_v31 = vmax.f32 %v41_v5, 0.0  ;;  %v51_v21 = vmax.f32 %v49_v8, 0.0  ;;  %v68_v44 = vmul.f32 %v382_v2, %v512_v32  ;;  %v677_v46 = vrot.slane %v505_v28, %v503_v27  ;;  %v407_v32 = vld [vmem:[%s796_s2 + $0xe0] sm:$0xff] }
  0x31   :  { %v183_v9 = vmax.f32 %v164_v57, %v181_v17  ;;  %v194_v10 = vmax.f32 %v175_v60, %v192_v39  ;;  %v79_v17 = vmul.f32 %v384_v26, %v493_v23  ;;  %v388_v39 = vld [vmem:[%s796_s2 + $0x48] sm:$0xff]  ;;  %v87_v15 = vmul.f32 %v384_v26, %v518_v34  ;;  %v390_v57 = vld [vmem:[%s796_s2 + $0x58] sm:$0xff] }
  0x32   :  { %v62_v47 = vmax.f32 %v43_v31, %v60_v30  ;;  %v98_v56 = vmul.f32 %v386_v24, %v499_v25  ;;  %v70_v23 = vmax.f32 %v51_v21, %v68_v44  ;;  %v690_v60 = vrot.slane %v536_v43, %v503_v27  ;;  %v392_v27 = vld [vmem:[%s796_s2 + $0x68] sm:$0xff] }
  0x33   :  { %v202_v33 = vmax.f32 %v183_v9, %v200_v40  ;;  %v213_v41 = vmax.f32 %v194_v10, %v211_v51  ;;  %v106_v51 = vmul.f32 %v386_v24, %v521_v35  ;;  %v694_v25 = vrot.slane %v505_v28, %v526_v37  ;;  %v409_v35 = vld [vmem:[%s796_s2 + $0xf0] sm:$0xff] }
  0x34   :  { %v81_v34 = vmax.f32 %v62_v47, %v79_v17  ;;  %v89_v5 = vmax.f32 %v70_v23, %v87_v15  ;;  %v125_v8 = vmul.f32 %v388_v39, %v544_v49  ;;  %v306_v26 = vmul.f32 %v407_v32, %v677_v46  ;;  %v394_v49 = vld [vmem:[%s796_s2 + $0x78] sm:$0xff] }
  0x35   :  { %v221_v22 = vmax.f32 %v202_v33, %v219_v52  ;;  %v232_v40 = vmax.f32 %v213_v41, %v230_v55  ;;  %v117_v52 = vmul.f32 %v388_v39, %v524_v36  ;;  %v707_v28 = vrot.slane %v536_v43, %v526_v37 }
  0x36   :  { %v100_v36 = vmax.f32 %v81_v34, %v98_v56  ;;  %v108_v10 = vmax.f32 %v89_v5, %v106_v51  ;;  %v144_v24 = vmul.f32 %v390_v57, %v552_v53  ;;  %v314_v31 = vmul.f32 %v407_v32, %v690_v60  ;;  %v396_v53 = vld [vmem:[%s796_s2 + $0x88] sm:$0xff] }
  0x37   :  { %v240_v55 = vmax.f32 %v221_v22, %v238_v62  ;;  %v251_v2 = vmax.f32 %v232_v40, %v249_v63  ;;  %v136_v62 = vmul.f32 %v390_v57, %v540_v45  ;;  %v325_v21 = vmul.f32 %v409_v35, %v694_v25 }
  0x38   :  { %v119_v30 = vmax.f32 %v100_v36, %v117_v52  ;;  %v155_v37 = vmul.f32 %v392_v27, %v555_v54  ;;  %v127_v41 = vmax.f32 %v108_v10, %v125_v8  ;;  %v163_v45 = vmul.f32 %v392_v27, %v561_v58  ;;  %v398_v54 = vld [vmem:[%s796_s2 + $0x98] sm:$0xff] }
  0x39   :  { %v259_v63 = vmax.f32 %v240_v55, %v257_v3  ;;  %v270_v9 = vmax.f32 %v251_v2, %v268_v4  ;;  %v333_v3 = vmul.f32 %v409_v35, %v707_v28  ;;  %v174_v44 = vmul.f32 %v394_v49, %v564_v59  ;;  %v400_v59 = vld [vmem:[%s796_s2 + $0xa8] sm:$0xff]  ;;  %v406_v8 = vld [vmem:[%s796_s2 + $0xd8] sm:$0xff] }
  0x3a   :  { %v138_v4 = vmax.f32 %v119_v30, %v136_v62  ;;  %v146_v47 = vmax.f32 %v127_v41, %v144_v24  ;;  %v182_v15 = vmul.f32 %v394_v49, %v570_v61  ;;  %v193_v58 = vmul.f32 %v396_v53, %v577_v6  ;;  %v404_v55 = vld [vmem:[%s796_s2 + $0xc8] sm:$0xff] }
  0x3b   :  { %v278_v43 = vmax.f32 %v259_v63, %v276_v11  ;;  %v289_v33 = vmax.f32 %v270_v9, %v287_v16  ;;  %v201_v40 = vmul.f32 %v396_v53, %v580_v7  ;;  %v212_v61 = vmul.f32 %v398_v54, %v590_v18  ;;  %v402_v7 = vld [vmem:[%s796_s2 + $0xb8] sm:$0xff]  ;;  %v408_v63 = vld [vmem:[%s796_s2 + $0xe8] sm:$0xff] }
  0x3c   :  { %v157_v11 = vmax.f32 %v138_v4, %v155_v37  ;;  %v165_v22 = vmax.f32 %v146_v47, %v163_v45  ;;  %v220_v23 = vmul.f32 %v398_v54, %v594_v12  ;;  %v231_v57 = vmul.f32 %v400_v59, %v598_v20 }
  0x3d   :  { %v297_v17 = vmax.f32 %v278_v43, %v295_v29  ;;  %v308_v39 = vmax.f32 %v289_v33, %v306_v26  ;;  %v239_v18 = vmul.f32 %v400_v59, %v608_v38  ;;  %v250_v5 = vmul.f32 %v402_v7, %v612_v13 }
  0x3e   :  { %v176_v29 = vmax.f32 %v157_v11, %v174_v44  ;;  %v184_v6 = vmax.f32 %v165_v22, %v182_v15  ;;  %v258_v38 = vmul.f32 %v402_v7, %v621_v42  ;;  %v269_v26 = vmul.f32 %v404_v55, %v625_v14  ;;  %v410_v14 = vld [vmem:[%s796_s2 + $0xf8] sm:$0xff] }
  0x3f   :  { %v316_v16 = vmax.f32 %v297_v17, %v314_v31  ;;  %v327_v56 = vmax.f32 %v308_v39, %v325_v21  ;;  %v277_v62 = vmul.f32 %v404_v55, %v632_v48  ;;  %v288_v42 = vmul.f32 %v406_v8, %v636_v50 }
  0x40   :  { %v195_v51 = vmax.f32 %v176_v29, %v193_v58  ;;  %v203_v52 = vmax.f32 %v184_v6, %v201_v40  ;;  %v296_v24 = vmul.f32 %v406_v8, %v649_v19  ;;  %v307_v49 = vmul.f32 %v408_v63, %v677_v46 }
  0x41   :  { %v335_v32 = vmax.f32 %v316_v16, %v333_v3  ;;  %337 = vst [vmem:[%s797_s3] sm:$0xff] %v327_v56  ;;  %v315_v48 = vmul.f32 %v408_v63, %v690_v60  ;;  %v326_v30 = vmul.f32 %v410_v14, %v694_v25  ;;  %v334_v43 = vmul.f32 %v410_v14, %v707_v28 }
  0x42   :  { %v214_v35 = vmax.f32 %v195_v51, %v212_v61  ;;  %v222_v20 = vmax.f32 %v203_v52, %v220_v23 }
  0x43   :  { %v341_v34 = vsel %vm339_vm0, %v335_v32, %v327_v56  ;;  %v355_v12 = vsel %vm339_vm0, %v335_v32, 0.0 }
  0x44   :  { %v343_v2 = vsub.f32 1.0, %v341_v34  ;;  %367 = vst [vmem:[%s795_s4 + $0x20] sm:$0xff] %v341_v34  ;;  %365 = vst [vmem:[%s795_s4 + $0x10] sm:$0xff] %v355_v12  ;;  %v233_v27 = vmax.f32 %v214_v35, %v231_v57  ;;  %v241_v36 = vmax.f32 %v222_v20, %v239_v18 }
  0x46   :  { %v345_v13 = vsel %vm339_vm0, %v335_v32, %v343_v2  ;;  %v252_v9 = vmax.f32 %v233_v27, %v250_v5  ;;  %v260_v10 = vmax.f32 %v241_v36, %v258_v38 }
  0x47   :  { %419 = vlog2.f32 %v345_v13 }
  0x48   :  { %v271_v0 = vmax.f32 %v252_v9, %v269_v26  ;;  %v279_v31 = vmax.f32 %v260_v10, %v277_v62 }
  0x4a   :  { %v290_v21 = vmax.f32 %v271_v0, %v288_v42  ;;  %v298_v37 = vmax.f32 %v279_v31, %v296_v24 }
  0x4c   :  { %v309_v50 = vmax.f32 %v290_v21, %v307_v49  ;;  %v317_v33 = vmax.f32 %v298_v37, %v315_v48 }
  0x4e   :  { %v328_v41 = vmax.f32 %v309_v50, %v326_v30  ;;  %v336_v45 = vmax.f32 %v317_v33, %v334_v43 }
  0x50   :  { %338 = vst [vmem:[%s797_s3 + $0x8] sm:$0xff] %v328_v41  ;;  %v342_v53 = vsel %vm340_vm1, %v336_v45, %v328_v41  ;;  %v356_v60 = vsel %vm340_vm1, %v336_v45, 0.0 }
  0x51   :  { %v420_v19 = vpop.eup %419  ;;  %v344_v3 = vsub.f32 1.0, %v342_v53  ;;  %368 = vst [vmem:[%s795_s4 + $0x28] sm:$0xff] %v342_v53  ;;  %366 = vst [vmem:[%s795_s4 + $0x18] sm:$0xff] %v356_v60 }
  0x52   :  { %v348_v46 = vmul.f32 0.6931472, %v420_v19 }
  0x53   :  { %v346_v1 = vsel %vm340_vm1, %v336_v45, %v344_v3 }
  0x54   :  { %v351_v4 = vmax.f32 %v348_v46, -100.0  ;;  %421 = vlog2.f32 %v346_v1 }
  0x56   :  { %363 = vst [vmem:[%s795_s4] sm:$0xff] %v351_v4 }
  0x5e   :  { %v422_v25 = vpop.eup %421 }
  0x5f   :  { %v350_v28 = vmul.f32 0.6931472, %v422_v25 }
  0x61   :  { %v352_v44 = vmax.f32 %v350_v28, -100.0 }
  0x63   :  { %364 = vst [vmem:[%s795_s4 + $0x8] sm:$0xff] %v352_v44 }

</bundles_post_ra>
